<compile_context>
chip_gen: v6e
topology: v6e:2x2x1
jax: 0.10.0
libtpu: 0.0.40
codegen_flags: <defaults>
</compile_context>

<pallas_src>
import functools
from typing import NamedTuple

import jax
import jax.numpy as jnp
from jax.experimental import pallas as pl
from jax.experimental.pallas import tpu as pltpu


_INV_SQRT2 = 0.7071067811865476


def _round_up(x, m):
    return (x + m - 1) // m * m


def _gelu_exact(x):
    # Matches torch.nn.GELU() default (erf-based, not tanh approximation).
    return 0.5 * x * (1.0 + jax.lax.erf(x * jnp.asarray(_INV_SQRT2, x.dtype)))


def _vmem_limit_bytes():
    """~75% of per-core VMEM; leaves headroom for compiler internal scratch."""
    cap = 64 * 1024 * 1024  # fallback: smallest current per-core VMEM (v7x)
    try:
        info_cap = getattr(pltpu.get_tpu_info(), "vmem_capacity_bytes", None)
        if info_cap:
            cap = int(info_cap)
    except Exception:
        pass
    return cap * 3 // 4


class MLPParams(NamedTuple):
    w1: jax.Array   # (E_pad, H_pad) bf16
    b1: jax.Array   # (1, H_pad)     f32
    w2: jax.Array   # (H_pad, E_pad) bf16
    b2: jax.Array   # (1, E_pad)     f32
    embed: int
    hidden: int
    e_pad: int
    h_pad: int
    tile_h: int


def prepare_mlp_params(w1, b1, w2, b2, *, tile_h=512):
    """Pad to lane-dense shapes and cast MXU operands to bf16 -- ONCE, at init.

    w1: (E, H), b1: (H,), w2: (H, E), b2: (E,) float32, with H = expansion * E.
    Hoisting this out of the forward call avoids re-reading/re-writing all
    weights in HBM on every forward pass.
    """
    E, H = w1.shape
    E_pad = _round_up(E, 128)
    tk = min(tile_h, _round_up(H, 128))   # hidden-strip width (multiple of 128)
    H_pad = _round_up(H, tk)              # so the K grid axis divides exactly
    # Zero padding: padded H columns give GELU(0)=0 and hit zero W2 rows; padded
    # E columns produce zeros that are sliced off in the wrapper.
    w1p = jnp.pad(w1, ((0, E_pad - E), (0, H_pad - H))).astype(jnp.bfloat16)
    w2p = jnp.pad(w2, ((0, H_pad - H), (0, E_pad - E))).astype(jnp.bfloat16)
    b1p = jnp.pad(b1, (0, H_pad - H)).reshape(1, H_pad).astype(jnp.float32)
    b2p = jnp.pad(b2, (0, E_pad - E)).reshape(1, E_pad).astype(jnp.float32)
    return MLPParams(w1p, b1p, w2p, b2p, E, H, E_pad, H_pad, tk)


def mlp_kernel(x_ref, w1_ref, b1_ref, w2_ref, b2_ref, o_ref, acc_ref,
               *, approximate_gelu=False):
    k = pl.program_id(1)

    @pl.when(k == 0)
    def _():
        acc_ref[...] = jnp.zeros_like(acc_ref)

    # dense_1 strip: (TM, E_pad) @ (E_pad, TK) -- bf16 MXU inputs, f32 accumulate.
    h = jnp.dot(x_ref[...], w1_ref[...], preferred_element_type=jnp.float32)
    h = h + b1_ref[...]
    if approximate_gelu:
        h = jax.nn.gelu(h, approximate=True)   # single EUP tanh (v6e/v7x option)
    else:
        h = _gelu_exact(h)                     # exact erf, matches nn.GELU default
    # dense_2 partial sum: (TM, TK) @ (TK, E_pad) accumulated in f32 scratch.
    acc_ref[...] += jnp.dot(h.astype(w2_ref.dtype), w2_ref[...],
                            preferred_element_type=jnp.float32)

    @pl.when(k == pl.num_programs(1) - 1)
    def _():
        # Dropout is identity in eval / inference mode.
        # TODO(synk): training-mode dropout (stochastic masking) not implemented.
        o_ref[...] = (acc_ref[...] + b2_ref[...]).astype(o_ref.dtype)


def mlp_forward(x, params: MLPParams, *, tile_m=256, approximate_gelu=False):
    """x: (B, S, E) float32. Returns (B, S, E) in x.dtype."""
    B, S, E = x.shape
    assert E == params.embed, "embed_size mismatch with prepared params"
    M = B * S
    E_pad, H_pad, tk = params.e_pad, params.h_pad, params.tile_h

    x2d = x.reshape(M, E)
    if E_pad != E:                 # skip the pad when E is already lane-dense
        x2d = jnp.pad(x2d, ((0, 0), (0, E_pad - E)))
    x_bf = x2d.astype(jnp.bfloat16)

    # Row tile: multiple of 16 (bf16 sublane packing); last block may be partial
    # so no garbage rows are computed or written back.
    tm = min(tile_m, _round_up(M, 16))
    grid = (pl.cdiv(M, tm), H_pad // tk)
    num_m = grid[0]

    cost = pl.CostEstimate(
        flops=4 * M * E_pad * H_pad,          # two matmuls
        transcendentals=M * H_pad,            # hint only; erf is a VPU polynomial
        bytes_accessed=(M * E_pad * 2                      # x (bf16)
                        + num_m * 2 * E_pad * H_pad * 2    # W1+W2 per row block
                        + num_m * (H_pad + E_pad) * 4      # biases
                        + M * E_pad * 4),                  # out (f32)
    )

    kernel = functools.partial(mlp_kernel, approximate_gelu=approximate_gelu)

    out2d = pl.pallas_call(
        kernel,
        out_shape=jax.ShapeDtypeStruct((M, E_pad), x.dtype),
        grid=grid,
        in_specs=[
            pl.BlockSpec((tm, E_pad), lambda i, k: (i, 0)),   # x rows (held over k)
            pl.BlockSpec((E_pad, tk), lambda i, k: (0, k)),   # W1 strip (streamed)
            pl.BlockSpec((1, tk), lambda i, k: (0, k)),       # b1 strip
            pl.BlockSpec((tk, E_pad), lambda i, k: (k, 0)),   # W2 strip (streamed)
            pl.BlockSpec((1, E_pad), lambda i, k: (0, 0)),    # b2 (tiny, constant)
        ],
        out_specs=pl.BlockSpec((tm, E_pad), lambda i, k: (i, 0)),
        scratch_shapes=[pltpu.VMEM((tm, E_pad), jnp.float32)],
        compiler_params=pltpu.CompilerParams(
            # TODO(synk): use pltpu.CORE_PARALLEL on the row axis for v7x's 2 TCs.
            dimension_semantics=("parallel", "arbitrary"),
            vmem_limit_bytes=_vmem_limit_bytes(),
        ),
        cost_estimate=cost,
    )(x_bf, params.w1, params.b1, params.w2, params.b2)

    return out2d[:, :E].reshape(B, S, E)


def init_mlp_params(key, embed_size, forward_expansion):
    """Deterministic init mimicking nn.Linear default (uniform +- 1/sqrt(fan_in))."""
    hidden = forward_expansion * embed_size
    k1, k2, k3, k4 = jax.random.split(key, 4)
    lim1 = 1.0 / jnp.sqrt(embed_size)
    lim2 = 1.0 / jnp.sqrt(hidden)
    # stored as (in, out) so the kernel does x @ W
    w1 = jax.random.uniform(k1, (embed_size, hidden), jnp.float32, -lim1, lim1)
    b1 = jax.random.uniform(k2, (hidden,), jnp.float32, -lim1, lim1)
    w2 = jax.random.uniform(k3, (hidden, embed_size), jnp.float32, -lim2, lim2)
    b2 = jax.random.uniform(k4, (embed_size,), jnp.float32, -lim2, lim2)
    return w1, b1, w2, b2


if __name__ == "__main__":
    # MLP(embed_size=32, forward_expansion=4, dropout=0.1) in eval mode.
    embed_size = 32
    forward_expansion = 4
    B, S = 2, 8

    key = jax.random.PRNGKey(0)
    kx, kp = jax.random.split(key)
    x = jax.random.normal(kx, (B, S, embed_size), dtype=jnp.float32)
    w1, b1, w2, b2 = init_mlp_params(kp, embed_size, forward_expansion)

    params = prepare_mlp_params(w1, b1, w2, b2)   # pad + bf16 cast once, at init
    out = mlp_forward(x, params)
    out = jax.block_until_ready(out)

    # Reference check (plain JAX, full f32). Tolerance loosened because the
    # kernel feeds bf16 operands to the MXU (f32 accumulation).
    ref_h = _gelu_exact(x.reshape(-1, embed_size) @ w1 + b1)
    ref = (ref_h @ w2 + b2).reshape(B, S, embed_size)
    assert out.shape == ref.shape
    assert jnp.allclose(out, ref, atol=2e-2, rtol=2e-2), "mismatch vs reference"

    print("KERNEL_OK")
</pallas_src>

<mosaic_0001>
module attributes {stable_mosaic.version = 11 : i64} {
  func.func @mlp_kernel(%arg0: i32, %arg1: i32, %arg2: memref<16x128xbf16, #tpu.memory_space<vmem>>, %arg3: memref<128x128xbf16, #tpu.memory_space<vmem>>, %arg4: memref<1x128xf32, #tpu.memory_space<vmem>>, %arg5: memref<128x128xbf16, #tpu.memory_space<vmem>>, %arg6: memref<1x128xf32, #tpu.memory_space<vmem>>, %arg7: memref<16x128xf32, #tpu.memory_space<vmem>>, %arg8: memref<16x128xf32, #tpu.memory_space<vmem>>) attributes {dimension_semantics = [#tpu.dimension_semantics<parallel>, #tpu.dimension_semantics<arbitrary>], iteration_bounds = array<i64: 1, 1>, scalar_prefetch = 0 : i64, scratch_operands = 1 : i64, tpu.core_type = #tpu.core_type<tc>, window_params = [{transform_indices = @transform_0, window_bounds = array<i64: 16, 128>}, {transform_indices = @transform_1, window_bounds = array<i64: 128, 128>}, {transform_indices = @transform_2, window_bounds = array<i64: 1, 128>}, {transform_indices = @transform_3, window_bounds = array<i64: 128, 128>}, {pipeline_mode = #tpu.pipeline_mode<synchronous>, transform_indices = @transform_4, window_bounds = array<i64: 1, 128>}, {transform_indices = @transform_5, window_bounds = array<i64: 16, 128>}]} {
    %c0_i32 = arith.constant 0 : i32
    %0 = arith.cmpi eq, %arg1, %c0_i32 : i32
    %1 = arith.extui %0 : i1 to i32
    %c0_i32_0 = arith.constant 0 : i32
    %2 = arith.cmpi ne, %1, %c0_i32_0 : i32
    scf.if %2 {
      %cst_18 = arith.constant 0.000000e+00 : f32
      %26 = vector.broadcast %cst_18 : f32 to vector<16x128xf32>
      %c0_19 = arith.constant 0 : index
      %c0_20 = arith.constant 0 : index
      %27 = vector.load %arg8[%c0_19, %c0_20] : memref<16x128xf32, #tpu.memory_space<vmem>>, vector<16x128xf32>
      tpu.vector_store %arg8[%c0_19, %c0_20], %26 {strides = array<i32>} : memref<16x128xf32, #tpu.memory_space<vmem>>, vector<16x128xf32>,
    } else {
    }
    %c0 = arith.constant 0 : index
    %c0_1 = arith.constant 0 : index
    %3 = vector.load %arg2[%c0, %c0_1] : memref<16x128xbf16, #tpu.memory_space<vmem>>, vector<16x128xbf16>
    %c0_2 = arith.constant 0 : index
    %c0_3 = arith.constant 0 : index
    %4 = vector.load %arg3[%c0_2, %c0_3] : memref<128x128xbf16, #tpu.memory_space<vmem>>, vector<128x128xbf16>
    %cst = arith.constant dense<0.000000e+00> : vector<16x128xf32>
    %5 = tpu.matmul %3, %4, %cst {dimension_numbers = #tpu.dot_dimension_numbers<[1], [0], [0], [1], [0, 0, 1, 1], [], []>} : vector<16x128xbf16>, vector<128x128xbf16>, vector<16x128xf32> -> vector<16x128xf32>
    %c0_4 = arith.constant 0 : index
    %c0_5 = arith.constant 0 : index
    %6 = vector.load %arg4[%c0_4, %c0_5] : memref<1x128xf32, #tpu.memory_space<vmem>>, vector<1x128xf32>
    %7 = vector.broadcast %6 : vector<1x128xf32> to vector<16x128xf32>
    %8 = arith.addf %5, %7 : vector<16x128xf32>
    %cst_6 = arith.constant 5.000000e-01 : f32
    %9 = vector.broadcast %cst_6 : f32 to vector<16x128xf32>
    %10 = arith.mulf %9, %8 : vector<16x128xf32>
    %cst_7 = arith.constant 0.707106769 : f32
    %11 = vector.broadcast %cst_7 : f32 to vector<16x128xf32>
    %12 = arith.mulf %8, %11 : vector<16x128xf32>
    %13 = math.erf %12 : vector<16x128xf32>
    %cst_8 = arith.constant 1.000000e+00 : f32
    %14 = vector.broadcast %cst_8 : f32 to vector<16x128xf32>
    %15 = arith.addf %14, %13 : vector<16x128xf32>
    %16 = arith.mulf %10, %15 : vector<16x128xf32>
    %c0_9 = arith.constant 0 : index
    %c0_10 = arith.constant 0 : index
    %17 = vector.load %arg8[%c0_9, %c0_10] : memref<16x128xf32, #tpu.memory_space<vmem>>, vector<16x128xf32>
    %18 = arith.truncf %16 : vector<16x128xf32> to vector<16x128xbf16>
    %c0_11 = arith.constant 0 : index
    %c0_12 = arith.constant 0 : index
    %19 = vector.load %arg5[%c0_11, %c0_12] : memref<128x128xbf16, #tpu.memory_space<vmem>>, vector<128x128xbf16>
    %cst_13 = arith.constant dense<0.000000e+00> : vector<16x128xf32>
    %20 = tpu.matmul %18, %19, %cst_13 {dimension_numbers = #tpu.dot_dimension_numbers<[1], [0], [0], [1], [0, 0, 1, 1], [], []>} : vector<16x128xbf16>, vector<128x128xbf16>, vector<16x128xf32> -> vector<16x128xf32>
    %21 = arith.addf %17, %20 : vector<16x128xf32>
    %c0_14 = arith.constant 0 : index
    %c0_15 = arith.constant 0 : index
    %22 = vector.load %arg8[%c0_14, %c0_15] : memref<16x128xf32, #tpu.memory_space<vmem>>, vector<16x128xf32>
    tpu.vector_store %arg8[%c0_14, %c0_15], %21 {strides = array<i32>} : memref<16x128xf32, #tpu.memory_space<vmem>>, vector<16x128xf32>,
    %c0_i32_16 = arith.constant 0 : i32
    %23 = arith.cmpi eq, %arg1, %c0_i32_16 : i32
    %24 = arith.extui %23 : i1 to i32
    %c0_i32_17 = arith.constant 0 : i32
    %25 = arith.cmpi ne, %24, %c0_i32_17 : i32
    scf.if %25 {
      %c0_18 = arith.constant 0 : index
      %c0_19 = arith.constant 0 : index
      %26 = vector.load %arg8[%c0_18, %c0_19] : memref<16x128xf32, #tpu.memory_space<vmem>>, vector<16x128xf32>
      %c0_20 = arith.constant 0 : index
      %c0_21 = arith.constant 0 : index
      %27 = vector.load %arg6[%c0_20, %c0_21] : memref<1x128xf32, #tpu.memory_space<vmem>>, vector<1x128xf32>
      %28 = vector.broadcast %27 : vector<1x128xf32> to vector<16x128xf32>
      %29 = arith.addf %26, %28 : vector<16x128xf32>
      %c0_22 = arith.constant 0 : index
      %c0_23 = arith.constant 0 : index
      %30 = vector.load %arg7[%c0_22, %c0_23] : memref<16x128xf32, #tpu.memory_space<vmem>>, vector<16x128xf32>
      tpu.vector_store %arg7[%c0_22, %c0_23], %29 {strides = array<i32>} : memref<16x128xf32, #tpu.memory_space<vmem>>, vector<16x128xf32>,
    } else {
    }
    return
  }
  func.func @transform_0(%arg0: i32, %arg1: i32) -> (i32, i32) {
    %c0_i32 = arith.constant 0 : i32
    %c0_i32_0 = arith.constant 0 : i32
    return %arg0, %c0_i32 : i32, i32
  }
  func.func @transform_1(%arg0: i32, %arg1: i32) -> (i32, i32) {
    %c0_i32 = arith.constant 0 : i32
    %c0_i32_0 = arith.constant 0 : i32
    return %c0_i32, %arg1 : i32, i32
  }
  func.func @transform_2(%arg0: i32, %arg1: i32) -> (i32, i32) {
    %c0_i32 = arith.constant 0 : i32
    %c0_i32_0 = arith.constant 0 : i32
    return %c0_i32, %arg1 : i32, i32
  }
  func.func @transform_3(%arg0: i32, %arg1: i32) -> (i32, i32) {
    %c0_i32 = arith.constant 0 : i32
    %c0_i32_0 = arith.constant 0 : i32
    return %arg1, %c0_i32 : i32, i32
  }
  func.func @transform_4(%arg0: i32, %arg1: i32) -> (i32, i32) {
    %c0_i32 = arith.constant 0 : i32
    %c0_i32_0 = arith.constant 0 : i32
    %c0_i32_1 = arith.constant 0 : i32
    return %c0_i32, %c0_i32_0 : i32, i32
  }
  func.func @transform_5(%arg0: i32, %arg1: i32) -> (i32, i32) {
    %c0_i32 = arith.constant 0 : i32
    %c0_i32_0 = arith.constant 0 : i32
    return %arg0, %c0_i32 : i32, i32
  }
}

</mosaic_0001>

<bundles_post_ra>
// kernel: tpu_custom_call.1
= control target key start
LH: loop header
LB: loop body
LE: loop exit
PB: predicated region body
PF: predicated region fallthrough
CT: control target
= control target key end

     0   :  { %10 = vsyncpa [#allocation4], 0  ;;  %s597_s0 = inlined_call_operand.hbm [shape: bf16[16,128], index: 0, kind: input, shape index: {}]   ;;  %s598_s1 = inlined_call_operand.hbm [shape: bf16[128,128], index: 1, kind: input, shape index: {}]   ;;  %s599_s2 = inlined_call_operand.vmem [shape: f32[1,128], index: 2, kind: input, shape index: {}]   ;;  %s600_s3 = inlined_call_operand.hbm [shape: bf16[128,128], index: 3, kind: input, shape index: {}]   ;;  %s601_s4 = inlined_call_operand.vmem [shape: f32[1,128], index: 4, kind: input, shape index: {}]   ;;  %s602_s5 = inlined_call_operand.hbm [shape: f32[16,128], index: 5, kind: output, shape index: {}]  }
   0x1   :  { %11 = vsyncpa [#allocation7], 0 }
   0x2   :  { %12 = vsyncpa [#allocation5], 0  ;;  %s539_s18 = smov [#allocation6]   ;;  %s540_s20 = smov [#allocation3]  }
   0x3   :  { %s30_s19 = sshll.u32 %s539_s18, 4  ;;  %s18_s21 = sshll.u32 %s540_s20, 4  ;;  %s31_s19 = int_to_ptr.vmem [resolvable:$true] %s30_s19  ;;  %s19_s21 = int_to_ptr.vmem [resolvable:$true] %s18_s21 }
   0x4   :  { %s461_s22 = scalar_lea.vmem %s31_s19, 1024  ;;  %p466_p1 = scmp.lt.s32.totalorder %s31_s19, %s31_s19 }
   0x5   :  { %p462_p0 = scmp.ne.s32.totalorder %s31_s19, %s461_s22  ;;  %p467_p2 = scmp.lt.s32.totalorder %s461_s22, %s461_s22 }
   0x7   :  { %p468_p3 = por %p467_p2, %p466_p1 }
   0x9   :  { %p469_p4 = pnand %p468_p3, %p462_p0 }
   0xb   :  { %472 = shalt.err (!%p469_p4)
}
   0xc   :  { %s541_s23 = smov 64   ;;  %s542_s24 = smov 4  }
   0xd   :  { %36 = dma.hbm_to_vmem [thread:$0]  %s598_s1, 1024, %s31_s19, [#allocation7], %s541_s23, %s541_s23, %s542_s24  }
   0xe   :  { %s481_s27 = scalar_lea.vmem %s19_s21, 128  ;;  %p486_p6 = scmp.lt.s32.totalorder %s19_s21, %s19_s21 }
   0xf   :  { %p482_p5 = scmp.ne.s32.totalorder %s19_s21, %s481_s27  ;;  %p487_p7 = scmp.lt.s32.totalorder %s481_s27, %s481_s27 }
  0x11   :  { %p488_p8 = por %p487_p7, %p486_p6 }
  0x13   :  { %p489_p9 = pnand %p488_p8, %p482_p5 }
  0x15   :  { %492 = shalt.err (!%p489_p9)
}
  0x16   :  { %24 = dma.hbm_to_vmem [thread:$0]  %s597_s0, 128, %s19_s21, [#allocation4], %s541_s23, %s541_s23, %s542_s24  }
  0x17   :  { %s543_s30 = smov [#allocation8]  }
  0x18   :  { %s44_s6 = sshll.u32 %s543_s30, 4  ;;  %s45_s6 = int_to_ptr.vmem [resolvable:$true] %s44_s6 }
  0x19   :  { %s501_s7 = scalar_lea.vmem %s45_s6, 1024  ;;  %p506_p11 = scmp.lt.s32.totalorder %s45_s6, %s45_s6 }
  0x1a   :  { %p502_p10 = scmp.ne.s32.totalorder %s45_s6, %s501_s7  ;;  %p507_p12 = scmp.lt.s32.totalorder %s501_s7, %s501_s7 }
  0x1c   :  { %p508_p13 = por %p507_p12, %p506_p11 }
  0x1e   :  { %p509_p0 = pnand %p508_p13, %p502_p10 }
  0x20   :  { %512 = shalt.err (!%p509_p0)
}
  0x21   :  { %50 = dma.hbm_to_vmem [thread:$0]  %s600_s3, 1024, %s45_s6, [#allocation7], %s541_s23, %s541_s23, %s542_s24  }
  0x22   :  { %533 = dma.done.wait [#allocation4], 128  }
  0x23   :  { %534 = vsyncadd [#allocation4], 4294967168 }
  0x24   :  { %535 = dma.done.wait [#allocation7], 2048  }
  0x25   :  { %536 = vsyncadd [#allocation7], 4294965248  ;;  %v544_v0 = vmov 0.0   ;;  %vm545_vm0 = vmmov 0   ;;  %v432_v1 = vld [vmem:[#allocation6 + $0x38] sm:$0xff]   ;;  %v433_v2 = vld [vmem:[#allocation6 + $0x30] sm:$0xff]  }
  0x26   :  { %382 = vmatprep.subr.bf16.mxu0 %v544_v0  ;;  %398 = vmatprep.mubr.msk.bf16.mxu0 %vm545_vm0, %v544_v0  ;;  %v434_v3 = vld [vmem:[#allocation6 + $0x28] sm:$0xff]   ;;  %v441_v4 = vld [vmem:[#allocation8 + $0x38] sm:$0xff]   ;;  %v435_v5 = vld [vmem:[#allocation6 + $0x20] sm:$0xff]   ;;  %s546_s10 = smov [#allocation9]  }
  0x27   :  { %402 = vmatprep.subr.bf16.mxu1 %v544_v0  ;;  %418 = vmatprep.mubr.msk.bf16.mxu1 %vm545_vm0, %v544_v0  ;;  %v436_v6 = vld [vmem:[#allocation6 + $0x18] sm:$0xff]   ;;  %v437_v7 = vld [vmem:[#allocation6 + $0x10] sm:$0xff]   ;;  %v438_v8 = vld [vmem:[#allocation6 + $0x8] sm:$0xff]   ;;  %s332_s11 = sshll.u32 %s546_s10, 4  ;;  %s333_s11 = int_to_ptr.vmem [resolvable:$true] %s332_s11 }
  0x28   :  { %383 = vmatpush3.bf16.msra.mxu0 %v432_v1  ;;  %403 = vmatpush3.bf16.msra.mxu1 %v441_v4  ;;  %v439_v9 = vld [vmem:[#allocation6] sm:$0xff]   ;;  %v440_v10 = vld [vmem:[#allocation3] sm:$0xff]   ;;  %v442_v11 = vld [vmem:[#allocation8 + $0x30] sm:$0xff]   ;;  %s513_s12 = scalar_lea.vmem %s333_s11, 256  ;;  %p518_p2 = scmp.lt.s32.totalorder %s333_s11, %s333_s11 }
  0x29   :  { %384 = vmatprep.subr.bf16.mxu0 %v544_v0  ;;  %404 = vmatprep.subr.bf16.mxu1 %v544_v0  ;;  %v443_v12 = vld [vmem:[#allocation8 + $0x28] sm:$0xff]   ;;  %v444_v13 = vld [vmem:[#allocation8 + $0x20] sm:$0xff]   ;;  %v445_v14 = vld [vmem:[#allocation8 + $0x18] sm:$0xff]   ;;  %p514_p1 = scmp.ne.s32.totalorder %s333_s11, %s513_s12  ;;  %p519_p3 = scmp.lt.s32.totalorder %s513_s12, %s513_s12 }
  0x2a   :  { %v446_v15 = vld [vmem:[#allocation8 + $0x10] sm:$0xff]   ;;  %v447_v16 = vld [vmem:[#allocation8 + $0x8] sm:$0xff]   ;;  %v448_v17 = vld [vmem:[#allocation8] sm:$0xff]  }
  0x2b   :  { %v345_v18 = vld [vmem:[%s599_s2] ss:$0 sm:$0xff]  ;;  %p520_p4 = por %p519_p3, %p518_p2 }
  0x2c   :  { %385 = vmatpush3.bf16.msra.mxu0 %v433_v2  ;;  %405 = vmatpush3.bf16.msra.mxu1 %v442_v11  ;;  %v363_v36 = vld [vmem:[%s601_s4] ss:$0 sm:$0xff] }
  0x2d   :  { %386 = vmatprep.subr.bf16.mxu0 %v544_v0  ;;  %406 = vmatprep.subr.bf16.mxu1 %v544_v0  ;;  %p521_p5 = pnand %p520_p4, %p514_p1 }
  0x30   :  { %387 = vmatpush3.bf16.msra.mxu0 %v434_v3  ;;  %407 = vmatpush3.bf16.msra.mxu1 %v443_v12 }
  0x31   :  { %388 = vmatprep.subr.bf16.mxu0 %v544_v0  ;;  %408 = vmatprep.subr.bf16.mxu1 %v544_v0 }
  0x34   :  { %389 = vmatpush3.bf16.msra.mxu0 %v435_v5  ;;  %409 = vmatpush3.bf16.msra.mxu1 %v444_v13 }
  0x35   :  { %390 = vmatprep.subr.bf16.mxu0 %v544_v0  ;;  %410 = vmatprep.subr.bf16.mxu1 %v544_v0 }
  0x38   :  { %391 = vmatpush3.bf16.msra.mxu0 %v436_v6  ;;  %411 = vmatpush3.bf16.msra.mxu1 %v445_v14 }
  0x39   :  { %392 = vmatprep.subr.bf16.mxu0 %v544_v0  ;;  %412 = vmatprep.subr.bf16.mxu1 %v544_v0 }
  0x3c   :  { %393 = vmatpush3.bf16.msra.mxu0 %v437_v7  ;;  %413 = vmatpush3.bf16.msra.mxu1 %v446_v15 }
  0x3d   :  { %394 = vmatprep.subr.bf16.mxu0 %v544_v0  ;;  %414 = vmatprep.subr.bf16.mxu1 %v544_v0 }
  0x40   :  { %395 = vmatpush3.bf16.msra.mxu0 %v438_v8  ;;  %415 = vmatpush3.bf16.msra.mxu1 %v447_v16 }
  0x41   :  { %396 = vmatprep.subr.bf16.mxu0 %v544_v0  ;;  %416 = vmatprep.subr.bf16.mxu1 %v544_v0 }
  0x44   :  { %397 = vmatpush3.bf16.msra.mxu0 %v439_v9  ;;  %417 = vmatpush3.bf16.msra.mxu1 %v448_v17 }
  0x47   :  { %399 = vmatmul.mubr.bf16.vlgmr.msra.gmra.mxu0 %v440_v10 }
 0x107   :  { %v182_v19 = vpop.f32.mrf.mxu0 }
 0x108   :  { %v183_v20 = vadd.f32 %v345_v18, %v182_v19 }
 0x109   :  { %v400_v21 = vpop.f32.mrf.mxu0 }
 0x10a   :  { %v191_v22 = vmul.f32 0.70710677, %v183_v20  ;;  %v189_v30 = vmul.f32 0.5, %v183_v20 }
 0x10b   :  { %v185_v23 = vpop.f32.mrf.mxu0 }
 0x10c   :  { %449 = verf.f32 %v191_v22  ;;  %v186_v24 = vadd.f32 %v345_v18, %v185_v23 }
 0x10d   :  { %v401_v25 = vpop.f32.mrf.mxu0 }
 0x10e   :  { %v192_v26 = vmul.f32 0.70710677, %v186_v24  ;;  %v190_v31 = vmul.f32 0.5, %v186_v24 }
 0x110   :  { %451 = verf.f32 %v192_v26 }
 0x119   :  { %v450_v27 = vpop.eup %449 }
 0x11a   :  { %v195_v28 = vadd.f32 1.0, %v450_v27 }
 0x11c   :  { %v197_v33 = vmul.f32 %v195_v28, %v189_v30 }
 0x11d   :  { %v452_v29 = vpop.eup %451 }
 0x11e   :  { %v196_v32 = vadd.f32 1.0, %v452_v29 }
 0x120   :  { %v198_v34 = vmul.f32 %v196_v32, %v190_v31 }
 0x122   :  { %v201_v35 = vpack.c.bf16 %v198_v34, %v197_v33 }
 0x124   :  { %419 = vmatmul.mubr.bf16.vlgmr.msra.gmra.mxu1 %v201_v35 }
 0x1e4   :  { %v300_v37 = vpop.f32.mrf.mxu1 }
 0x1e5   :  { %v323_v38 = vadd.f32 %v363_v36, %v300_v37 }
 0x1e6   :  { %v420_v39 = vpop.f32.mrf.mxu1 }
 0x1e7   :  { %325 = vst [vmem:[#allocation9] sm:$0xff] %v323_v38 }
 0x1e8   :  { %v303_v40 = vpop.f32.mrf.mxu1 }
 0x1e9   :  { %v324_v41 = vadd.f32 %v363_v36, %v303_v40 }
 0x1ea   :  { %v421_v42 = vpop.f32.mrf.mxu1 }
 0x1eb   :  { %326 = vst [vmem:[#allocation9 + $0x8] sm:$0xff] %v324_v41 }
 0x1ec   :  { %524 = shalt.err (!%p521_p5)
}
 0x1ed   :  { %s547_s13 = smov 128   ;;  %s548_s4 = smov 8  }
 0x1ee   :  { %338 = dma.vmem_to_hbm [thread:$0]  %s333_s11, 256, %s602_s5, [#allocation5], %s547_s13, %s547_s13, %s548_s4  }
 0x1ef   :  { %537 = dma.done.wait [#allocation5], 256  }
 0x1f0   :  { %538 = vsyncadd [#allocation5], 4294967040 }
 0x1f1   :  { %342 = vsyncpa [#allocation4], 1 }
 0x1f2   :  { %343 = vsyncpa [#allocation7], 1 }
 0x1f3   :  { %344 = vsyncpa [#allocation5], 1 }

</bundles_post_ra>
